<compile_context>
chip_gen: v7x
topology: tpu7x:2x2x1
jax: 0.10.0
libtpu: 0.0.40
codegen_flags: <defaults>
</compile_context>

<pallas_src>
import functools
import math

import jax
import jax.numpy as jnp
from jax.experimental import pallas as pl
from jax.experimental.pallas import tpu as pltpu


def _round_up(x: int, m: int) -> int:
    return ((x + m - 1) // m) * m


def _linear_kernel(x_ref, wt_ref, b_ref, o_ref):
    # x_ref : (tm, tk)  activation tile
    # wt_ref: (tk, tn)  weight tile in [K, N] layout (K on sublanes -> MXU-native)
    # b_ref : (1,  tn)  bias tile
    # o_ref : (tm, tn)  f32 output tile; resident across the K grid axis,
    #                   used directly as the accumulator.
    k = pl.program_id(2)

    @pl.when(k == 0)
    def _():
        # Seed the resident output tile with the broadcast bias; this replaces
        # a separate scratch accumulator + epilogue copy.
        o_ref[...] = jnp.broadcast_to(b_ref[...], o_ref.shape).astype(o_ref.dtype)

    o_ref[...] += jnp.dot(
        x_ref[...], wt_ref[...], preferred_element_type=jnp.float32
    ).astype(o_ref.dtype)


@functools.partial(jax.jit, static_argnames=("tm", "tn", "tk"))
def deepspeed_test_m_forward(x, weight, bias, *, tm=512, tn=512, tk=512):
    """Forward pass of DeepSpeedTestM with self.linear = nn.Linear(in, out).

    x:      [..., K]  activations (any number of leading dims)
    weight: [N, K]    PyTorch nn.Linear weight layout
    bias:   [N]
    returns [..., N]
    """
    lead = x.shape[:-1]
    K = x.shape[-1]
    N, K_w = weight.shape
    assert K_w == K, "weight in_features must match x's last dim"
    M = int(math.prod(lead)) if lead else 1

    # Tile selection: a dim that fits in one tile uses the full dim as the
    # block (no (8,128) constraint, no padding).  Larger dims use aligned
    # tiles; M/N edges rely on Pallas write-masking, K is zero-padded.
    tm_eff = M if M <= tm else tm          # tm default multiple of 8
    tn_eff = N if N <= tn else tn          # tn default multiple of 128
    tk_eff = K if K <= tk else tk          # tk default multiple of 128

    x2d = x.reshape(M, K)
    wt = weight.T                          # [K, N]; single wrapper-side transpose

    if tk_eff < K and K % tk_eff != 0:
        # Zero-padding K is required for reduction correctness when tiled.
        K_pad = _round_up(K, tk_eff)
        x2d = jnp.pad(x2d, ((0, 0), (0, K_pad - K)))
        wt = jnp.pad(wt, ((0, K_pad - K), (0, 0)))
    else:
        K_pad = K

    b2d = bias.reshape(1, N)

    grid = (pl.cdiv(M, tm_eff), pl.cdiv(N, tn_eff), K_pad // tk_eff)
    gm, gn, _ = grid

    # Truthful HBM-traffic estimate: each x tile is re-read per N-tile, each
    # weight tile per M-tile, the output is written once.
    cost = pl.CostEstimate(
        flops=2 * M * N * K_pad,
        bytes_accessed=4 * (M * K_pad * gn + K_pad * N * gm + M * N + N),
        transcendentals=0,
    )

    # Double-buffered working set (+bias) with headroom; capped for v7x VMEM.
    tile_bytes = 4 * (
        2 * tm_eff * tk_eff + 2 * tk_eff * tn_eff + 2 * tm_eff * tn_eff + 2 * tn_eff
    )
    vmem_limit = int(min(48 << 20, max(2 * tile_bytes, 16 << 20)))

    out2d = pl.pallas_call(
        _linear_kernel,
        out_shape=jax.ShapeDtypeStruct((M, N), jnp.float32),
        grid_spec=pltpu.PrefetchScalarGridSpec(
            num_scalar_prefetch=0,
            grid=grid,
            in_specs=[
                pl.BlockSpec((tm_eff, tk_eff), lambda i, j, k: (i, k)),  # x
                pl.BlockSpec((tk_eff, tn_eff), lambda i, j, k: (k, j)),  # W^T [K,N]
                pl.BlockSpec((1, tn_eff), lambda i, j, k: (0, j)),       # bias
            ],
            out_specs=pl.BlockSpec((tm_eff, tn_eff), lambda i, j, k: (i, j)),
        ),
        compiler_params=pltpu.CompilerParams(
            dimension_semantics=("parallel", "parallel", "arbitrary"),
            vmem_limit_bytes=vmem_limit,
        ),
        cost_estimate=cost,
    )(x2d, wt, b2d)

    return out2d.astype(x.dtype).reshape(*lead, N)


if __name__ == "__main__":
    key = jax.random.PRNGKey(0)
    kx, kw, kb = jax.random.split(key, 3)

    # Small shapes consistent with DeepSpeedTestM's single nn.Linear:
    # batch=2, seq=8, in_features=32, out_features=32.
    B, S, K, N = 2, 8, 32, 32
    x = jax.random.normal(kx, (B, S, K), dtype=jnp.float32)
    bound = 1.0 / (K ** 0.5)  # mimic nn.Linear's uniform(-1/sqrt(K), 1/sqrt(K)) init
    weight = jax.random.uniform(kw, (N, K), minval=-bound, maxval=bound,
                                dtype=jnp.float32)
    bias = jax.random.uniform(kb, (N,), minval=-bound, maxval=bound,
                              dtype=jnp.float32)

    z = deepspeed_test_m_forward(x, weight, bias)
    jax.block_until_ready(z)
    ref = x @ weight.T + bias
    assert z.shape == (B, S, N)
    assert jnp.allclose(z, ref, atol=1e-5, rtol=1e-5)

    # Second check: exercises the tiled path (multiple M tiles with a masked
    # edge block and ragged-K zero padding).
    k2x, k2w, k2b = jax.random.split(jax.random.PRNGKey(1), 3)
    M2, K2, N2 = 640, 640, 384
    x2 = jax.random.normal(k2x, (1, M2, K2), dtype=jnp.float32)
    w2 = jax.random.normal(k2w, (N2, K2), dtype=jnp.float32) * 0.05
    b2 = jax.random.normal(k2b, (N2,), dtype=jnp.float32)
    z2 = deepspeed_test_m_forward(x2, w2, b2)
    jax.block_until_ready(z2)
    ref2 = x2 @ w2.T + b2
    assert z2.shape == (1, M2, N2)
    assert jnp.allclose(z2, ref2, atol=1e-3, rtol=1e-3)

    print("KERNEL_OK")
</pallas_src>

<mosaic_0001>
module attributes {stable_mosaic.version = 11 : i64} {
  func.func @_linear_kernel(%arg0: i32, %arg1: i32, %arg2: i32, %arg3: memref<16x32xf32, #tpu.memory_space<vmem>>, %arg4: memref<32x32xf32, #tpu.memory_space<vmem>>, %arg5: memref<1x32xf32, #tpu.memory_space<vmem>>, %arg6: memref<16x32xf32, #tpu.memory_space<vmem>>) attributes {dimension_semantics = [#tpu.dimension_semantics<parallel>, #tpu.dimension_semantics<parallel>, #tpu.dimension_semantics<arbitrary>], iteration_bounds = array<i64: 1, 1, 1>, scalar_prefetch = 0 : i64, scratch_operands = 0 : i64, tpu.core_type = #tpu.core_type<tc>, window_params = [{transform_indices = @transform_0, window_bounds = array<i64: 16, 32>}, {transform_indices = @transform_1, window_bounds = array<i64: 32, 32>}, {transform_indices = @transform_2, window_bounds = array<i64: 1, 32>}, {transform_indices = @transform_3, window_bounds = array<i64: 16, 32>}]} {
    %c0_i32 = arith.constant 0 : i32
    %0 = arith.cmpi eq, %arg2, %c0_i32 : i32
    %1 = arith.extui %0 : i1 to i32
    %c0_i32_0 = arith.constant 0 : i32
    %2 = arith.cmpi ne, %1, %c0_i32_0 : i32
    scf.if %2 {
      %c0_8 = arith.constant 0 : index
      %c0_9 = arith.constant 0 : index
      %9 = vector.load %arg5[%c0_8, %c0_9] : memref<1x32xf32, #tpu.memory_space<vmem>>, vector<1x32xf32>
      %10 = vector.shape_cast %9 : vector<1x32xf32> to vector<1x32xf32>
      %11 = vector.broadcast %10 : vector<1x32xf32> to vector<16x32xf32>
      %c0_10 = arith.constant 0 : index
      %c0_11 = arith.constant 0 : index
      %12 = vector.load %arg6[%c0_10, %c0_11] : memref<16x32xf32, #tpu.memory_space<vmem>>, vector<16x32xf32>
      tpu.vector_store %arg6[%c0_10, %c0_11], %11 {strides = array<i32>} : memref<16x32xf32, #tpu.memory_space<vmem>>, vector<16x32xf32>,
    } else {
    }
    %c0 = arith.constant 0 : index
    %c0_1 = arith.constant 0 : index
    %3 = vector.load %arg6[%c0, %c0_1] : memref<16x32xf32, #tpu.memory_space<vmem>>, vector<16x32xf32>
    %c0_2 = arith.constant 0 : index
    %c0_3 = arith.constant 0 : index
    %4 = vector.load %arg3[%c0_2, %c0_3] : memref<16x32xf32, #tpu.memory_space<vmem>>, vector<16x32xf32>
    %c0_4 = arith.constant 0 : index
    %c0_5 = arith.constant 0 : index
    %5 = vector.load %arg4[%c0_4, %c0_5] : memref<32x32xf32, #tpu.memory_space<vmem>>, vector<32x32xf32>
    %cst = arith.constant dense<0.000000e+00> : vector<16x32xf32>
    %6 = tpu.matmul %4, %5, %cst {dimension_numbers = #tpu.dot_dimension_numbers<[1], [0], [0], [1], [0, 0, 1, 1], [], []>} : vector<16x32xf32>, vector<32x32xf32>, vector<16x32xf32> -> vector<16x32xf32>
    %7 = arith.addf %3, %6 : vector<16x32xf32>
    %c0_6 = arith.constant 0 : index
    %c0_7 = arith.constant 0 : index
    %8 = vector.load %arg6[%c0_6, %c0_7] : memref<16x32xf32, #tpu.memory_space<vmem>>, vector<16x32xf32>
    tpu.vector_store %arg6[%c0_6, %c0_7], %7 {strides = array<i32>} : memref<16x32xf32, #tpu.memory_space<vmem>>, vector<16x32xf32>,
    return
  }
  func.func @transform_0(%arg0: i32, %arg1: i32, %arg2: i32) -> (i32, i32) {
    %c0_i32 = arith.constant 0 : i32
    return %arg0, %arg2 : i32, i32
  }
  func.func @transform_1(%arg0: i32, %arg1: i32, %arg2: i32) -> (i32, i32) {
    %c0_i32 = arith.constant 0 : i32
    return %arg2, %arg1 : i32, i32
  }
  func.func @transform_2(%arg0: i32, %arg1: i32, %arg2: i32) -> (i32, i32) {
    %c0_i32 = arith.constant 0 : i32
    %c0_i32_0 = arith.constant 0 : i32
    return %c0_i32, %arg1 : i32, i32
  }
  func.func @transform_3(%arg0: i32, %arg1: i32, %arg2: i32) -> (i32, i32) {
    %c0_i32 = arith.constant 0 : i32
    return %arg0, %arg1 : i32, i32
  }
}

</mosaic_0001>

<bundles_post_ra>
// kernel: deepspeed_test_m_forward.1
= control target key start
LH: loop header
LB: loop body
LE: loop exit
PB: predicated region body
PF: predicated region fallthrough
CT: control target
= control target key end

     0   :  { %vm26_vm0 = vcmask 261120   ;;  %s256_s0 = inlined_call_operand.vmem [shape: f32[16,32], index: 0, kind: input, shape index: {}]   ;;  %s257_s1 = inlined_call_operand.vmem [shape: f32[32,32], index: 1, kind: input, shape index: {}]   ;;  %s258_s2 = inlined_call_operand.vmem [shape: f32[1,32], index: 2, kind: input, shape index: {}]   ;;  %s259_s3 = inlined_call_operand.hbm [shape: f32[16,32], index: 3, kind: output, shape index: {}]  }
   0x1   :  { %v33_v0 = vld [vmem:[%s257_s1] sm:$0xff]  ;;  %v34_v1 = vld [vmem:[%s257_s1 + $0x8] sm:$0xff]  ;;  %v35_v2 = vld [vmem:[%s257_s1 + $0x10] sm:$0xff] }
   0x2   :  { %v159_v3 = vpack.c.bf16 %v34_v1, %v33_v0  ;;  %v36_v4 = vld [vmem:[%s257_s1 + $0x18] sm:$0xff]  ;;  %v31_v5 = vld [vmem:[%s256_s0] sm:$0xff] }
   0x3   :  { %v163_v6 = vpack.c.bf16 %v36_v4, %v35_v2  ;;  %156 = vmatprep.mubr.msk.f32.mxu0 %vm26_vm0, %v31_v5  ;;  %v139_v7 = vld [vmem:[%s258_s2] ss:$0 sm:$0xff] }
   0x4   :  { %8 = vsyncpa [#allocation3], 0  ;;  %160 = vmatprep.subr.bf16.mxu0 %v159_v3  ;;  %28 = vst.msk [vmem:[#allocation2 + $0x8] sm:$0xff] %vm26_vm0, %v139_v7  ;;  %v32_v8 = vld [vmem:[%s256_s0 + $0x8] sm:$0xff]  ;;  %s194_s25 = smov [#allocation2]  }
   0x5   :  { %27 = vst.msk [vmem:[#allocation2] sm:$0xff] %vm26_vm0, %v139_v7  ;;  %162 = vmatpush3.bf16.msra.mxu0 %v159_v3  ;;  %s128_s26 = sshll.u32 %s194_s25, 4  ;;  %s129_s26 = int_to_ptr.vmem [resolvable:$true] %s128_s26 }
   0x6   :  { %164 = vmatprep.subr.bf16.mxu0 %v163_v6  ;;  %s170_s2 = scalar_lea.vmem %s129_s26, 256  ;;  %p175_p1 = scmp.lt.s32.totalorder %s129_s26, %s129_s26 }
   0x7   :  { %p171_p0 = scmp.ne.s32.totalorder %s129_s26, %s170_s2  ;;  %p176_p2 = scmp.lt.s32.totalorder %s170_s2, %s170_s2 }
   0x9   :  { %166 = vmatpush3.bf16.msra.mxu0 %v163_v6  ;;  %p177_p3 = por %p176_p2, %p175_p1 }
   0xb   :  { %v30_v9 = vld [vmem:[#allocation2 + $0x8] sm:$0xff]  ;;  %p178_p4 = pnand %p177_p3, %p171_p0 }
   0xc   :  { %157 = vmatmul.mubr.msk.f32.vlgmr.msra.gmra.mrb[0].mxu0 %vm26_vm0, %v32_v8  ;;  %v29_v10 = vld [vmem:[#allocation2] sm:$0xff] }
  0xdf   :  { %v158_v11 = vpop.f32.mrb[0].mxu0 }
  0xe0   :  { %v120_v12 = vadd.f32 %v158_v11, %v30_v9  ;;  %v110_v13 = vpop.f32.mrb[1].mxu0 }
  0xe1   :  { %v119_v14 = vadd.f32 %v110_v13, %v29_v10 }
  0xe2   :  { %122 = vst.msk [vmem:[#allocation2 + $0x8] sm:$0xff] %vm26_vm0, %v120_v12 }
  0xe3   :  { %121 = vst.msk [vmem:[#allocation2] sm:$0xff] %vm26_vm0, %v119_v14 }
  0xe4   :  { %181 = shalt.err (!%p178_p4)
}
  0xe5   :  { %s182_s28 = scalar_lea.hbm %s259_s3, 256 }
  0xe6   :  { %p183_p5 = scmp.ne.s32.totalorder %s259_s3, %s182_s28  ;;  %p186_p6 = scmp.lt.u32.totalorder %s182_s28, %s259_s3 }
  0xe8   :  { %p188_p7 = pnand %p186_p6, %p183_p5 }
  0xea   :  { %191 = shalt.err (!%p188_p7)
}
  0xeb   :  { %s195_s6 = smov 128   ;;  %s196_s7 = smov 8  }
  0xec   :  { %134 = dma.vmem_to_hbm [thread:$0]  %s129_s26, 256, %s259_s3, [#allocation3], %s195_s6, %s195_s6, %s196_s7  }
  0xed   :  { %192 = dma.done.wait [#allocation3], 256  }
  0xee   :  { %193 = vsyncadd [#allocation3], 4294967040 }
  0xef   :  { %138 = vsyncpa [#allocation3], 1 }

</bundles_post_ra>
